<compile_context>
chip_gen: v5e
topology: v5e:2x2
jax: 0.10.0
libtpu: 0.0.40
codegen_flags: <defaults>
</compile_context>

<pallas_src>
import numpy as np
import jax
import jax.numpy as jnp
from jax.experimental import pallas as pl
from jax.experimental.pallas import tpu as pltpu

NUM_LAYERS = 3
IN_CH = 9          # in_channels
HID = 9            # hidden_channels
OUT_CH = 2         # out_channels (lin2)
NUM_CLASSES = 2
INCLUDE_LABEL = 0  # one_hot concat branch skipped (falsy)

# ---- packed weight-slab layout (row offsets padded to multiples of 8) ------
OFF_W1 = (0, 16, 32)      # 3 x Linear(9, 18)  with mlp-BN folded    [9, 18]
OFF_W2 = (48, 72, 96)     # 3 x Linear(18, 9)  with outer-BN folded  [18, 9]
OFF_LIN1 = 120            # lin1 with batch_norm1 folded             [9, 9]
OFF_L2S = 136             # lin2_w @ seq_w                           [9, 2]
OFF_B1 = 152              # rows 152..154: folded mlp biases         [18]
OFF_B2 = 155              # rows 155..157: folded conv-out biases    [9]
OFF_LIN1B = 158           # folded lin1 bias                         [9]
OFF_L2SB = 159            # lin2_b @ seq_w + seq_b                   [2]
SLAB_ROWS = 160
SLAB_COLS = 2 * HID       # 18


def gin_kernel(x_ref, a_ref, p_ref, w_ref, out_ref):
    # x_ref: [N, 9]   a_ref: [3, N, N] (eps folded)   p_ref: [G, N]
    # w_ref: [160, 18] packed weight slab             out_ref: [G, 2]
    x = x_ref[...]
    # 3 x ( GINConv(mlp) -> BatchNorm -> ReLU ), statically unrolled.
    for l in range(NUM_LAYERS):
        # (1+eps)*x + sum_{j->i} x_j  ==  (A + (1+eps)I) @ x
        h = jnp.dot(a_ref[l], x, preferred_element_type=jnp.float32)
        # mlp Linear(9,18) with BN(18) folded, then ReLU
        h = (jnp.dot(h, w_ref[OFF_W1[l]:OFF_W1[l] + HID, 0:2 * HID],
                     preferred_element_type=jnp.float32)
             + w_ref[OFF_B1 + l:OFF_B1 + l + 1, 0:2 * HID])
        h = jnp.maximum(h, 0.0)
        # mlp Linear(18,9) with batch_norms[l] folded, then outer ReLU
        h = (jnp.dot(h, w_ref[OFF_W2[l]:OFF_W2[l] + 2 * HID, 0:HID],
                     preferred_element_type=jnp.float32)
             + w_ref[OFF_B2 + l:OFF_B2 + l + 1, 0:HID])
        x = jnp.maximum(h, 0.0)
    # global_add_pool(x, batch)
    g = jnp.dot(p_ref[...], x, preferred_element_type=jnp.float32)     # [G, 9]
    # F.relu(batch_norm1(lin1(g)))  (BN folded into lin1)
    g = (jnp.dot(g, w_ref[OFF_LIN1:OFF_LIN1 + HID, 0:HID],
                 preferred_element_type=jnp.float32)
         + w_ref[OFF_LIN1B:OFF_LIN1B + 1, 0:HID])
    g = jnp.maximum(g, 0.0)
    # F.dropout(p=0.5, training=False) -> identity; lin2 and seq pre-multiplied
    out_ref[...] = (jnp.dot(g, w_ref[OFF_L2S:OFF_L2S + HID, 0:NUM_CLASSES],
                            preferred_element_type=jnp.float32)
                    + w_ref[OFF_L2SB:OFF_L2SB + 1, 0:NUM_CLASSES]
                    ).astype(out_ref.dtype)


def gin_forward(w_slab, x, a_eps, p):
    """x: [B,N,9], a_eps: [B,3,N,N], p: [B,G,N], w_slab: [160,18] -> [B,G,2]."""
    B, N, _ = x.shape
    G = p.shape[1]
    return pl.pallas_call(
        gin_kernel,
        out_shape=jax.ShapeDtypeStruct((B, G, NUM_CLASSES), jnp.float32),
        grid=(B,),
        in_specs=[
            pl.BlockSpec((None, N, IN_CH), lambda b: (b, 0, 0)),
            pl.BlockSpec((None, NUM_LAYERS, N, N), lambda b: (b, 0, 0, 0)),
            pl.BlockSpec((None, G, N), lambda b: (b, 0, 0)),
            pl.BlockSpec((SLAB_ROWS, SLAB_COLS), lambda b: (0, 0)),
        ],
        out_specs=pl.BlockSpec((None, G, NUM_CLASSES), lambda b: (b, 0, 0)),
        compiler_params=pltpu.CompilerParams(
            dimension_semantics=("parallel",)),
    )(x, a_eps, p, w_slab)


# ----------------------- parameter construction (glue) -----------------------

def _linear_init(key, fan_in, fan_out):
    kw, kb = jax.random.split(key)
    bound = 1.0 / np.sqrt(fan_in)
    w = jax.random.uniform(kw, (fan_in, fan_out), jnp.float32, -bound, bound)
    b = jax.random.uniform(kb, (1, fan_out), jnp.float32, -bound, bound)
    return w, b


def _bn_fold(key, ch, eps=1e-5):
    kg, kb = jax.random.split(key)
    gamma = jax.random.uniform(kg, (1, ch), jnp.float32, 0.5, 1.5)
    beta = jax.random.uniform(kb, (1, ch), jnp.float32, -0.1, 0.1)
    mean = jnp.zeros((1, ch), jnp.float32)   # running stats of a fresh module
    var = jnp.ones((1, ch), jnp.float32)
    scale = gamma / jnp.sqrt(var + eps)
    shift = beta - mean * scale
    return scale, shift


def init_raw_params(key):
    keys = jax.random.split(key, 4 * NUM_LAYERS + 4)
    w1, b1, s1, t1, w2, b2, so, to = [], [], [], [], [], [], [], []
    for l in range(NUM_LAYERS):
        k0, k1, k2, k3 = keys[4 * l:4 * l + 4]
        wa, ba = _linear_init(k0, HID, 2 * HID)          # Linear(in, 2*hidden)
        sa, ta = _bn_fold(k1, 2 * HID)                   # BatchNorm(2*hidden)
        wb, bb = _linear_init(k2, 2 * HID, HID)          # Linear(2*hidden, hidden)
        sb, tb = _bn_fold(k3, HID)                       # batch_norms[l]
        w1.append(wa); b1.append(ba); s1.append(sa); t1.append(ta)
        w2.append(wb); b2.append(bb); so.append(sb); to.append(tb)
    k_lin1, k_bn1, k_lin2, k_seq = keys[4 * NUM_LAYERS:]
    lin1_w, lin1_b = _linear_init(k_lin1, HID, HID)
    bn1_s, bn1_t = _bn_fold(k_bn1, HID)
    lin2_w, lin2_b = _linear_init(k_lin2, HID, OUT_CH)
    seq_w, seq_b = _linear_init(k_seq, OUT_CH + INCLUDE_LABEL, NUM_CLASSES)
    return dict(
        eps=jnp.array([0.0, 0.1, 0.2], jnp.float32),     # GINConv train_eps params
        w1=jnp.stack(w1), b1=jnp.stack(b1), s1=jnp.stack(s1), t1=jnp.stack(t1),
        w2=jnp.stack(w2), b2=jnp.stack(b2), so=jnp.stack(so), to=jnp.stack(to),
        lin1_w=lin1_w, lin1_b=lin1_b, bn1_s=bn1_s, bn1_t=bn1_t,
        lin2_w=lin2_w, lin2_b=lin2_b, seq_w=seq_w, seq_b=seq_b,
    )


def build_weight_slab(raw):
    """Fold all eval-mode BNs into the preceding Linears, pre-multiply lin2@seq,
    and pack everything into one [160, 18] f32 slab."""
    w1f = raw["w1"] * raw["s1"]                           # [3, 9, 18]
    b1f = raw["b1"] * raw["s1"] + raw["t1"]               # [3, 1, 18]
    w2f = raw["w2"] * raw["so"]                           # [3, 18, 9]
    b2f = raw["b2"] * raw["so"] + raw["to"]               # [3, 1, 9]
    lin1_wf = raw["lin1_w"] * raw["bn1_s"]                # [9, 9]
    lin1_bf = raw["lin1_b"] * raw["bn1_s"] + raw["bn1_t"] # [1, 9]
    l2s_w = raw["lin2_w"] @ raw["seq_w"]                  # [9, 2]
    l2s_b = raw["lin2_b"] @ raw["seq_w"] + raw["seq_b"]   # [1, 2]

    slab = jnp.zeros((SLAB_ROWS, SLAB_COLS), jnp.float32)
    for l in range(NUM_LAYERS):
        slab = slab.at[OFF_W1[l]:OFF_W1[l] + HID, 0:2 * HID].set(w1f[l])
        slab = slab.at[OFF_W2[l]:OFF_W2[l] + 2 * HID, 0:HID].set(w2f[l])
        slab = slab.at[OFF_B1 + l, 0:2 * HID].set(b1f[l, 0])
        slab = slab.at[OFF_B2 + l, 0:HID].set(b2f[l, 0])
    slab = slab.at[OFF_LIN1:OFF_LIN1 + HID, 0:HID].set(lin1_wf)
    slab = slab.at[OFF_LIN1B, 0:HID].set(lin1_bf[0])
    slab = slab.at[OFF_L2S:OFF_L2S + HID, 0:NUM_CLASSES].set(l2s_w)
    slab = slab.at[OFF_L2SB, 0:NUM_CLASSES].set(l2s_b[0])
    return slab


def build_a_eps(A, eps):
    """A: [B, N, N] -> [B, 3, N, N] with (1+eps_l) folded into the diagonal."""
    N = A.shape[-1]
    eye = jnp.eye(N, dtype=jnp.float32)
    return A[:, None, :, :] + (1.0 + eps)[None, :, None, None] * eye[None, None]


# ------------------------- pure-JAX reference (check) ------------------------

def reference_single(raw, x, a, p):
    for l in range(NUM_LAYERS):
        h = (1.0 + raw["eps"][l]) * x + a @ x
        h = h @ raw["w1"][l] + raw["b1"][l]
        h = jnp.maximum(h * raw["s1"][l] + raw["t1"][l], 0.0)
        h = h @ raw["w2"][l] + raw["b2"][l]
        x = jnp.maximum(h * raw["so"][l] + raw["to"][l], 0.0)
    g = p @ x
    g = g @ raw["lin1_w"] + raw["lin1_b"]
    g = jnp.maximum(g * raw["bn1_s"] + raw["bn1_t"], 0.0)
    g = g @ raw["lin2_w"] + raw["lin2_b"]
    return g @ raw["seq_w"] + raw["seq_b"]


if __name__ == "__main__":
    key = jax.random.PRNGKey(0)
    B, N, E, G = 8, 16, 40, 4                    # graph-batches, nodes, edges, graphs
    k_feat, k_src, k_dst, k_param = jax.random.split(key, 4)

    x = jax.random.normal(k_feat, (B, N, IN_CH), jnp.float32)        # data.x
    src = jax.random.randint(k_src, (B, E), 0, N)                    # edge_index[0]
    dst = jax.random.randint(k_dst, (B, E), 0, N)                    # edge_index[1]
    batch_vec = jnp.repeat(jnp.arange(G), N // G)                    # data.batch

    # glue: dense adjacency (scatter-add of messages src -> dst) and pooling matrix
    def make_adj(s, d):
        return jnp.zeros((N, N), jnp.float32).at[d, s].add(1.0)
    A = jax.vmap(make_adj)(src, dst)                                 # [B, N, N]
    P = (batch_vec[None, :] == jnp.arange(G)[:, None]).astype(jnp.float32)
    P = jnp.broadcast_to(P, (B, G, N))                               # [B, G, N]

    raw = init_raw_params(k_param)
    w_slab = build_weight_slab(raw)                                  # [160, 18]
    a_eps = build_a_eps(A, raw["eps"])                               # [B, 3, N, N]

    out = jax.block_until_ready(gin_forward(w_slab, x, a_eps, P))
    ref = jax.vmap(lambda xx, aa, pp: reference_single(raw, xx, aa, pp))(x, A, P)

    assert out.shape == (B, G, NUM_CLASSES)
    np.testing.assert_allclose(np.asarray(out), np.asarray(ref), rtol=1e-4, atol=1e-4)
    print("KERNEL_OK")
</pallas_src>

<mosaic_0001>
module attributes {stable_mosaic.version = 11 : i64} {
  func.func @gin_kernel(%arg0: i32, %arg1: memref<1x16x9xf32, #tpu.memory_space<vmem>>, %arg2: memref<1x3x16x16xf32, #tpu.memory_space<vmem>>, %arg3: memref<1x4x16xf32, #tpu.memory_space<vmem>>, %arg4: memref<160x18xf32, #tpu.memory_space<vmem>>, %arg5: memref<1x4x2xf32, #tpu.memory_space<vmem>>) attributes {dimension_semantics = [#tpu.dimension_semantics<parallel>], iteration_bounds = array<i64: 8>, scalar_prefetch = 0 : i64, scratch_operands = 0 : i64, tpu.core_type = #tpu.core_type<tc>, window_params = [{transform_indices = @transform_0, window_bounds = array<i64: 1, 16, 9>}, {transform_indices = @transform_1, window_bounds = array<i64: 1, 3, 16, 16>}, {transform_indices = @transform_2, window_bounds = array<i64: 1, 4, 16>}, {pipeline_mode = #tpu.pipeline_mode<synchronous>, transform_indices = @transform_3, window_bounds = array<i64: 160, 18>}, {transform_indices = @transform_4, window_bounds = array<i64: 1, 4, 2>}]} {
    %c0 = arith.constant 0 : index
    %c0_0 = arith.constant 0 : index
    %c0_1 = arith.constant 0 : index
    %0 = vector.load %arg1[%c0, %c0_0, %c0_1] : memref<1x16x9xf32, #tpu.memory_space<vmem>>, vector<1x16x9xf32>
    %1 = vector.shape_cast %0 : vector<1x16x9xf32> to vector<16x9xf32>
    %c0_2 = arith.constant 0 : index
    %c0_3 = arith.constant 0 : index
    %c0_4 = arith.constant 0 : index
    %c0_5 = arith.constant 0 : index
    %2 = vector.load %arg2[%c0_2, %c0_3, %c0_4, %c0_5] : memref<1x3x16x16xf32, #tpu.memory_space<vmem>>, vector<1x1x16x16xf32>
    %3 = vector.shape_cast %2 : vector<1x1x16x16xf32> to vector<16x16xf32>
    %cst = arith.constant dense<0.000000e+00> : vector<16x9xf32>
    %4 = tpu.matmul %3, %1, %cst {dimension_numbers = #tpu.dot_dimension_numbers<[1], [0], [0], [1], [0, 0, 1, 1], [], []>} : vector<16x16xf32>, vector<16x9xf32>, vector<16x9xf32> -> vector<16x9xf32>
    %c0_6 = arith.constant 0 : index
    %c0_7 = arith.constant 0 : index
    %5 = vector.load %arg4[%c0_6, %c0_7] : memref<160x18xf32, #tpu.memory_space<vmem>>, vector<9x18xf32>
    %cst_8 = arith.constant dense<0.000000e+00> : vector<16x18xf32>
    %6 = tpu.matmul %4, %5, %cst_8 {dimension_numbers = #tpu.dot_dimension_numbers<[1], [0], [0], [1], [0, 0, 1, 1], [], []>} : vector<16x9xf32>, vector<9x18xf32>, vector<16x18xf32> -> vector<16x18xf32>
    %c152 = arith.constant 152 : index
    %c0_9 = arith.constant 0 : index
    %7 = vector.load %arg4[%c152, %c0_9] : memref<160x18xf32, #tpu.memory_space<vmem>>, vector<1x18xf32>
    %8 = vector.broadcast %7 : vector<1x18xf32> to vector<16x18xf32>
    %9 = arith.addf %6, %8 : vector<16x18xf32>
    %cst_10 = arith.constant 0.000000e+00 : f32
    %10 = vector.broadcast %cst_10 : f32 to vector<16x18xf32>
    %11 = arith.maximumf %9, %10 : vector<16x18xf32>
    %c48 = arith.constant 48 : index
    %c0_11 = arith.constant 0 : index
    %12 = vector.load %arg4[%c48, %c0_11] : memref<160x18xf32, #tpu.memory_space<vmem>>, vector<18x9xf32>
    %cst_12 = arith.constant dense<0.000000e+00> : vector<16x9xf32>
    %13 = tpu.matmul %11, %12, %cst_12 {dimension_numbers = #tpu.dot_dimension_numbers<[1], [0], [0], [1], [0, 0, 1, 1], [], []>} : vector<16x18xf32>, vector<18x9xf32>, vector<16x9xf32> -> vector<16x9xf32>
    %c155 = arith.constant 155 : index
    %c0_13 = arith.constant 0 : index
    %14 = vector.load %arg4[%c155, %c0_13] : memref<160x18xf32, #tpu.memory_space<vmem>>, vector<1x9xf32>
    %15 = vector.broadcast %14 : vector<1x9xf32> to vector<16x9xf32>
    %16 = arith.addf %13, %15 : vector<16x9xf32>
    %cst_14 = arith.constant 0.000000e+00 : f32
    %17 = vector.broadcast %cst_14 : f32 to vector<16x9xf32>
    %18 = arith.maximumf %16, %17 : vector<16x9xf32>
    %c0_15 = arith.constant 0 : index
    %c1 = arith.constant 1 : index
    %c0_16 = arith.constant 0 : index
    %c0_17 = arith.constant 0 : index
    %19 = vector.load %arg2[%c0_15, %c1, %c0_16, %c0_17] : memref<1x3x16x16xf32, #tpu.memory_space<vmem>>, vector<1x1x16x16xf32>
    %20 = vector.shape_cast %19 : vector<1x1x16x16xf32> to vector<16x16xf32>
    %cst_18 = arith.constant dense<0.000000e+00> : vector<16x9xf32>
    %21 = tpu.matmul %20, %18, %cst_18 {dimension_numbers = #tpu.dot_dimension_numbers<[1], [0], [0], [1], [0, 0, 1, 1], [], []>} : vector<16x16xf32>, vector<16x9xf32>, vector<16x9xf32> -> vector<16x9xf32>
    %c16 = arith.constant 16 : index
    %c0_19 = arith.constant 0 : index
    %22 = vector.load %arg4[%c16, %c0_19] : memref<160x18xf32, #tpu.memory_space<vmem>>, vector<9x18xf32>
    %cst_20 = arith.constant dense<0.000000e+00> : vector<16x18xf32>
    %23 = tpu.matmul %21, %22, %cst_20 {dimension_numbers = #tpu.dot_dimension_numbers<[1], [0], [0], [1], [0, 0, 1, 1], [], []>} : vector<16x9xf32>, vector<9x18xf32>, vector<16x18xf32> -> vector<16x18xf32>
    %c153 = arith.constant 153 : index
    %c0_21 = arith.constant 0 : index
    %24 = vector.load %arg4[%c153, %c0_21] : memref<160x18xf32, #tpu.memory_space<vmem>>, vector<1x18xf32>
    %25 = vector.broadcast %24 : vector<1x18xf32> to vector<16x18xf32>
    %26 = arith.addf %23, %25 : vector<16x18xf32>
    %cst_22 = arith.constant 0.000000e+00 : f32
    %27 = vector.broadcast %cst_22 : f32 to vector<16x18xf32>
    %28 = arith.maximumf %26, %27 : vector<16x18xf32>
    %c72 = arith.constant 72 : index
    %c0_23 = arith.constant 0 : index
    %29 = vector.load %arg4[%c72, %c0_23] : memref<160x18xf32, #tpu.memory_space<vmem>>, vector<18x9xf32>
    %cst_24 = arith.constant dense<0.000000e+00> : vector<16x9xf32>
    %30 = tpu.matmul %28, %29, %cst_24 {dimension_numbers = #tpu.dot_dimension_numbers<[1], [0], [0], [1], [0, 0, 1, 1], [], []>} : vector<16x18xf32>, vector<18x9xf32>, vector<16x9xf32> -> vector<16x9xf32>
    %c156 = arith.constant 156 : index
    %c0_25 = arith.constant 0 : index
    %31 = vector.load %arg4[%c156, %c0_25] : memref<160x18xf32, #tpu.memory_space<vmem>>, vector<1x9xf32>
    %32 = vector.broadcast %31 : vector<1x9xf32> to vector<16x9xf32>
    %33 = arith.addf %30, %32 : vector<16x9xf32>
    %cst_26 = arith.constant 0.000000e+00 : f32
    %34 = vector.broadcast %cst_26 : f32 to vector<16x9xf32>
    %35 = arith.maximumf %33, %34 : vector<16x9xf32>
    %c0_27 = arith.constant 0 : index
    %c2 = arith.constant 2 : index
    %c0_28 = arith.constant 0 : index
    %c0_29 = arith.constant 0 : index
    %36 = vector.load %arg2[%c0_27, %c2, %c0_28, %c0_29] : memref<1x3x16x16xf32, #tpu.memory_space<vmem>>, vector<1x1x16x16xf32>
    %37 = vector.shape_cast %36 : vector<1x1x16x16xf32> to vector<16x16xf32>
    %cst_30 = arith.constant dense<0.000000e+00> : vector<16x9xf32>
    %38 = tpu.matmul %37, %35, %cst_30 {dimension_numbers = #tpu.dot_dimension_numbers<[1], [0], [0], [1], [0, 0, 1, 1], [], []>} : vector<16x16xf32>, vector<16x9xf32>, vector<16x9xf32> -> vector<16x9xf32>
    %c32 = arith.constant 32 : index
    %c0_31 = arith.constant 0 : index
    %39 = vector.load %arg4[%c32, %c0_31] : memref<160x18xf32, #tpu.memory_space<vmem>>, vector<9x18xf32>
    %cst_32 = arith.constant dense<0.000000e+00> : vector<16x18xf32>
    %40 = tpu.matmul %38, %39, %cst_32 {dimension_numbers = #tpu.dot_dimension_numbers<[1], [0], [0], [1], [0, 0, 1, 1], [], []>} : vector<16x9xf32>, vector<9x18xf32>, vector<16x18xf32> -> vector<16x18xf32>
    %c154 = arith.constant 154 : index
    %c0_33 = arith.constant 0 : index
    %41 = vector.load %arg4[%c154, %c0_33] : memref<160x18xf32, #tpu.memory_space<vmem>>, vector<1x18xf32>
    %42 = vector.broadcast %41 : vector<1x18xf32> to vector<16x18xf32>
    %43 = arith.addf %40, %42 : vector<16x18xf32>
    %cst_34 = arith.constant 0.000000e+00 : f32
    %44 = vector.broadcast %cst_34 : f32 to vector<16x18xf32>
    %45 = arith.maximumf %43, %44 : vector<16x18xf32>
    %c96 = arith.constant 96 : index
    %c0_35 = arith.constant 0 : index
    %46 = vector.load %arg4[%c96, %c0_35] : memref<160x18xf32, #tpu.memory_space<vmem>>, vector<18x9xf32>
    %cst_36 = arith.constant dense<0.000000e+00> : vector<16x9xf32>
    %47 = tpu.matmul %45, %46, %cst_36 {dimension_numbers = #tpu.dot_dimension_numbers<[1], [0], [0], [1], [0, 0, 1, 1], [], []>} : vector<16x18xf32>, vector<18x9xf32>, vector<16x9xf32> -> vector<16x9xf32>
    %c157 = arith.constant 157 : index
    %c0_37 = arith.constant 0 : index
    %48 = vector.load %arg4[%c157, %c0_37] : memref<160x18xf32, #tpu.memory_space<vmem>>, vector<1x9xf32>
    %49 = vector.broadcast %48 : vector<1x9xf32> to vector<16x9xf32>
    %50 = arith.addf %47, %49 : vector<16x9xf32>
    %cst_38 = arith.constant 0.000000e+00 : f32
    %51 = vector.broadcast %cst_38 : f32 to vector<16x9xf32>
    %52 = arith.maximumf %50, %51 : vector<16x9xf32>
    %c0_39 = arith.constant 0 : index
    %c0_40 = arith.constant 0 : index
    %c0_41 = arith.constant 0 : index
    %53 = vector.load %arg3[%c0_39, %c0_40, %c0_41] : memref<1x4x16xf32, #tpu.memory_space<vmem>>, vector<1x4x16xf32>
    %54 = vector.shape_cast %53 : vector<1x4x16xf32> to vector<4x16xf32>
    %cst_42 = arith.constant dense<0.000000e+00> : vector<4x9xf32>
    %55 = tpu.matmul %54, %52, %cst_42 {dimension_numbers = #tpu.dot_dimension_numbers<[1], [0], [0], [1], [0, 0, 1, 1], [], []>} : vector<4x16xf32>, vector<16x9xf32>, vector<4x9xf32> -> vector<4x9xf32>
    %c120 = arith.constant 120 : index
    %c0_43 = arith.constant 0 : index
    %56 = vector.load %arg4[%c120, %c0_43] : memref<160x18xf32, #tpu.memory_space<vmem>>, vector<9x9xf32>
    %cst_44 = arith.constant dense<0.000000e+00> : vector<4x9xf32>
    %57 = tpu.matmul %55, %56, %cst_44 {dimension_numbers = #tpu.dot_dimension_numbers<[1], [0], [0], [1], [0, 0, 1, 1], [], []>} : vector<4x9xf32>, vector<9x9xf32>, vector<4x9xf32> -> vector<4x9xf32>
    %c158 = arith.constant 158 : index
    %c0_45 = arith.constant 0 : index
    %58 = vector.load %arg4[%c158, %c0_45] : memref<160x18xf32, #tpu.memory_space<vmem>>, vector<1x9xf32>
    %59 = vector.broadcast %58 : vector<1x9xf32> to vector<4x9xf32>
    %60 = arith.addf %57, %59 : vector<4x9xf32>
    %cst_46 = arith.constant 0.000000e+00 : f32
    %61 = vector.broadcast %cst_46 : f32 to vector<4x9xf32>
    %62 = arith.maximumf %60, %61 : vector<4x9xf32>
    %c136 = arith.constant 136 : index
    %c0_47 = arith.constant 0 : index
    %63 = vector.load %arg4[%c136, %c0_47] : memref<160x18xf32, #tpu.memory_space<vmem>>, vector<9x2xf32>
    %cst_48 = arith.constant dense<0.000000e+00> : vector<4x2xf32>
    %64 = tpu.matmul %62, %63, %cst_48 {dimension_numbers = #tpu.dot_dimension_numbers<[1], [0], [0], [1], [0, 0, 1, 1], [], []>} : vector<4x9xf32>, vector<9x2xf32>, vector<4x2xf32> -> vector<4x2xf32>
    %c159 = arith.constant 159 : index
    %c0_49 = arith.constant 0 : index
    %65 = vector.load %arg4[%c159, %c0_49] : memref<160x18xf32, #tpu.memory_space<vmem>>, vector<1x2xf32>
    %66 = vector.broadcast %65 : vector<1x2xf32> to vector<4x2xf32>
    %67 = arith.addf %64, %66 : vector<4x2xf32>
    %c0_50 = arith.constant 0 : index
    %c0_51 = arith.constant 0 : index
    %c0_52 = arith.constant 0 : index
    %68 = vector.load %arg5[%c0_50, %c0_51, %c0_52] : memref<1x4x2xf32, #tpu.memory_space<vmem>>, vector<1x4x2xf32>
    %69 = vector.shape_cast %68 : vector<1x4x2xf32> to vector<4x2xf32>
    %70 = vector.shape_cast %67 : vector<4x2xf32> to vector<1x4x2xf32>
    tpu.vector_store %arg5[%c0_50, %c0_51, %c0_52], %70 {strides = array<i32>} : memref<1x4x2xf32, #tpu.memory_space<vmem>>, vector<1x4x2xf32>,
    return
  }
  func.func @transform_0(%arg0: i32) -> (i32, i32, i32) {
    %c0_i32 = arith.constant 0 : i32
    %c0_i32_0 = arith.constant 0 : i32
    %c0_i32_1 = arith.constant 0 : i32
    return %arg0, %c0_i32, %c0_i32_0 : i32, i32, i32
  }
  func.func @transform_1(%arg0: i32) -> (i32, i32, i32, i32) {
    %c0_i32 = arith.constant 0 : i32
    %c0_i32_0 = arith.constant 0 : i32
    %c0_i32_1 = arith.constant 0 : i32
    %c0_i32_2 = arith.constant 0 : i32
    return %arg0, %c0_i32, %c0_i32_0, %c0_i32_1 : i32, i32, i32, i32
  }
  func.func @transform_2(%arg0: i32) -> (i32, i32, i32) {
    %c0_i32 = arith.constant 0 : i32
    %c0_i32_0 = arith.constant 0 : i32
    %c0_i32_1 = arith.constant 0 : i32
    return %arg0, %c0_i32, %c0_i32_0 : i32, i32, i32
  }
  func.func @transform_3(%arg0: i32) -> (i32, i32) {
    %c0_i32 = arith.constant 0 : i32
    %c0_i32_0 = arith.constant 0 : i32
    %c0_i32_1 = arith.constant 0 : i32
    return %c0_i32, %c0_i32_0 : i32, i32
  }
  func.func @transform_4(%arg0: i32) -> (i32, i32, i32) {
    %c0_i32 = arith.constant 0 : i32
    %c0_i32_0 = arith.constant 0 : i32
    %c0_i32_1 = arith.constant 0 : i32
    return %arg0, %c0_i32, %c0_i32_0 : i32, i32, i32
  }
}

</mosaic_0001>

<bundles_post_ra>
// kernel: tpu_custom_call.1
= control target key start
LH: loop header
LB: loop body
LE: loop exit
PB: predicated region body
PF: predicated region fallthrough
CT: control target
= control target key end

     0   :  { %9 = vsyncpa [#allocation3], 0  ;;  %s1168_s0 = inlined_call_operand.vmem [shape: f32[8,16,9], index: 0, kind: input, shape index: {}]   ;;  %s1169_s1 = inlined_call_operand.hbm [shape: f32[8,3,16,16], index: 1, kind: input, shape index: {}]   ;;  %s1170_s2 = inlined_call_operand.vmem [shape: f32[8,4,16], index: 2, kind: input, shape index: {}]   ;;  %s1171_s3 = inlined_call_operand.vmem [shape: f32[160,18], index: 3, kind: input, shape index: {}]   ;;  %s1172_s4 = inlined_call_operand.vmem [shape: f32[8,4,2], index: 4, kind: output, shape index: {}]  }
   0x1   :  { %11 = vsyncpa [#allocation3 + $0x1], 0  ;;  %s954_s15 = smov 0   ;;  %s956_s16 = smov 0  }
   0x2   :  { %s958_s17 = smov 0   ;;  %s960_s18 = smov 0  }
   0x3 LB: > { %s973_s19 = sadd.s32 4294967295, %s925_s18   ;;  %s976_s20 = sadd.s32 1, %s925_s18   ;;  %s925_s18 = sphi %s960_s18, %s1178_s18   ;;  %s921_s17 = sphi %s958_s17, %s1177_s17   ;;  %s917_s16 = sphi %s956_s16, %s1176_s16   ;;  %s913_s15 = sphi %s954_s15, %s1175_s15  }
   0x4   : > { %s47_s21 = ssub.s32 %s925_s18, %s976_s20  ;;  %s50_s22 = sadd.s32 1, %s921_s17 }
   0x5   : > { %p48_p0 = scmp.eq.s32.totalorder %s47_s21, 0  ;;  %p57_p1 = scmp.ne.s32.totalorder %s921_s17, %s917_s16 }
   0x6   : > { %p58_p2 = scmp.eq.s32.totalorder %s925_s18, 0  ;;  %p63_p3 = scmp.ne.s32.totalorder %s917_s16, %s913_s15 }
   0x7   : > { %s986_s23 = scalar_select %p48_p0, %s921_s17, %s50_s22  }
   0x8   : > { %p59_p4 = por %p58_p2, %p57_p1  ;;  %p64_p5 = scmp.eq.s32.totalorder %s973_s19, 0 }
   0x9   : > { %p818_p6 = scmp.lt.s32.totalorder %s925_s18, 8  ;;  %s171_s25 = sand.u32 1, %s921_s17  }
   0xa   : > { %p990_p7 = por %p64_p5, %p63_p3  ;;  %s809_s26 = smul.u32 48, %s171_s25 }
   0xb   : > { %s810_s27 = smul.u32 48, %s925_s18  ;;  %p996_p8 = pnand %p818_p6, %p59_p4 }
   0xc   : > { %s175_s6 = scalar_lea.vmem [#allocation2], %s809_s26  ;;  %p768_p9 = scmp.ge.s32.totalorder %s925_s18, 1 }
   0xd   : > { %s180_s5 = scalar_lea.hbm %s1169_s1, %s810_s27  ;;  %s183_s7 = sshll.u32 %s175_s6, 4  ;;  %s184_s7 = int_to_ptr.vmem [resolvable:$true] %s183_s7 }
   0xe   : > { %s181_s8 = sshll.u32 %s180_s5, 4  ;;  %s172_s9 = scalar_lea.sflag [#allocation3], %s171_s25  ;;  %s182_s8 = int_to_ptr.hbm [resolvable:$true] %s181_s8 }
   0xf   : > { %s861_s10 = sshra.s32 %s182_s8, 4  ;;  %p865_p11 = pneg %p996_p8  ;;  %s862_s10 = int_to_ptr.hbm [resolvable:$true] %s861_s10 }
  0x10   : > { %s863_s11 = scalar_lea.hbm %s862_s10, 48  ;;  %s868_s14 = scalar_lea.hbm %s1169_s1, 384 }
  0x11   : > { %p864_p10 = scmp.ne.s32.totalorder %s862_s10, %s863_s11  ;;  %p869_p0 = scmp.lt.s32.totalorder %s862_s10, %s1169_s1 }
  0x12   : > { %p870_p1 = scmp.lt.s32.totalorder %s868_s14, %s863_s11 }
  0x13   : > { %p866_p12 = pnand %p865_p11, %p864_p10 }
  0x14   : > { %p871_p2 = por %p870_p1, %p869_p0 }
  0x15   : > { %p867_p13 = pneg %p866_p12 }
  0x17   : > { %p872_p3 = pnand %p871_p2, %p867_p13 }
  0x19   : > { %875 = shalt.err (!%p872_p3)
}
  0x1a   : > { %s927_s22 = smov 128   ;;  %s928_s25 = smov 8  }
  0x1b   : > { %817 = dma.hbm_to_vmem [thread:$0]  (!%p996_p8), %s182_s8, 768, %s184_s7, %s172_s9, %s927_s22, %s927_s22, %s928_s25  }
  0x1c   : > { %p198_p4 = scmp.lt.s32.totalorder %s925_s18, 9 }
  0x1e   : > { %p199_p5 = pnand %p768_p9, %p198_p4 }
  0x1f   : > { %s204_s26 = sand.u32 (!%p199_p5), 1, %s917_s16  }
  0x20   : > { %202 = sbr.rel (%p199_p5) target bundleno = 1659 (0x67b), region = 36  ;;  %s205_s29 = scalar_lea.sflag (!%p199_p5), [#allocation3], %s204_s26 }
  0x21   : > { %s811_s27 = smul.u32 (!%p199_p5), 48, %s204_s26 }
  0x23   : > { %s1018_s30 = scalar_lea.vmem (!%p199_p5), [#allocation2], %s811_s27 }
  0x25   : > { %908 = dma.done.wait (%p990_p7), %s205_s29, 768  }
  0x26   : > { %910 = vsyncadd (%p990_p7), %s205_s29, 4294966528  ;;  %p242_p6 = scmp.lt.s32.totalorder %s973_s19, 7  ;;  %vm300_vm0 = vcmask 1040384   ;;  %v257_v2 = vld [vmem:[%s1018_s30] sm:$0xff]  ;;  %vm259_vm1 = vcmask 130048   ;;  %v258_v4 = vld [vmem:[%s1018_s30 + $0x8] sm:$0xff] }
  0x27   : > { %v290_v3 = vld [vmem:[%s1171_s3 + $0x8] sm:$0x1]  ;;  %v289_v5 = vld [vmem:[%s1171_s3] sm:$0xff]  ;;  %vm293_vm2 = vcmask 72704   ;;  %vm341_vm3 = vcmask 1041408   ;;  %v330_v9 = vld [vmem:[%s1171_s3 + $0x38] sm:$0xff] }
  0x28   : > { %s1180_s19 = smov (!%p242_p6, %s973_s19), 7  ;;  %775 = vmatpush.msk.msra.mxu1 %vm300_vm0, %v290_v3  ;;  %v331_v8 = vld [vmem:[%s1171_s3 + $0x40] sm:$0x3]  ;;  %v329_v10 = vld [vmem:[%s1171_s3 + $0x30] sm:$0xff]  ;;  %v853_v11 = vld [vmem:[%s1171_s3 + $0x98] ss:$0 sm:$0xff] }
  0x29   : > { %s808_s18 = sshll.u32 %s1180_s19, 4  ;;  %778 = vmatpush.msk.msra.mxu2 %vm341_vm3, %v331_v8  ;;  %vm334_vm4 = vcmask 146432   ;;  %v403_v18 = vld [vmem:[%s1171_s3 + $0x18] sm:$0x1]  ;;  %v854_v20 = vld [vmem:[%s1171_s3 + $0x9b] ss:$0 sm:$0xff] }
  0x2a   : > { %s246_s6 = scalar_lea.vmem %s1168_s0, %s808_s18  ;;  %319 = vmatpush.msra.mxu1 %v289_v5  ;;  %v781_v26 = vld [vmem:[%s1018_s30 + $0x10] sm:$0xff]  ;;  %v782_v27 = vld [vmem:[%s1018_s30 + $0x18] sm:$0xff]  ;;  %v791_v49 = vld [vmem:[%s1018_s30 + $0x20] sm:$0xff]  ;;  %s771_s11 = sshll.u32 %s1180_s19, 2  ;;  %vm673_vm5 = vcmask 11264  }
  0x2b   : > { %v256_v0 = vld [vmem:[%s246_s6 + $0x8] sm:$0xff]  ;;  %v255_v1 = vld [vmem:[%s246_s6] sm:$0xff]  ;;  %359 = vmatpush.msra.mxu2 %v330_v9  ;;  %v402_v28 = vld [vmem:[%s1171_s3 + $0x10] sm:$0xff]  ;;  %s250_s14 = scalar_lea.vmem %s1170_s2, %s771_s11  ;;  %s254_s28 = scalar_lea.vmem %s1172_s4, %s771_s11 }
  0x2c   : > { %280 = vmatpush.msra.mxu0 %v256_v0  ;;  %v442_v31 = vld [vmem:[%s1171_s3 + $0x58] sm:$0x3]  ;;  %v441_v32 = vld [vmem:[%s1171_s3 + $0x50] sm:$0xff]  ;;  %v440_v33 = vld [vmem:[%s1171_s3 + $0x48] sm:$0xff] }
  0x2d   : > { %360 = vmatpush.msra.mxu2 %v329_v10  ;;  %788 = vmatpush.msk.msrb.mxu1 %vm341_vm3, %v442_v31  ;;  %v855_v34 = vld [vmem:[%s1171_s3 + $0x99] ss:$0 sm:$0xff]  ;;  %v512_v41 = vld [vmem:[%s1171_s3 + $0x28] sm:$0x1]  ;;  %v856_v43 = vld [vmem:[%s1171_s3 + $0x9c] ss:$0 sm:$0xff] }
  0x2e   : > { %281 = vmatpush.msra.mxu0 %v255_v1  ;;  %v792_v50 = vld [vmem:[%s1018_s30 + $0x28] sm:$0xff]  ;;  %v511_v51 = vld [vmem:[%s1171_s3 + $0x20] sm:$0xff]  ;;  %v551_v54 = vld [vmem:[%s1171_s3 + $0x70] sm:$0x3] }
  0x2f   : > { %773 = vmatmul.msk.f32.vlgmr.msra.gmra.mxu0 %vm259_vm1, %v257_v2  ;;  %468 = vmatpush.msrb.mxu1 %v441_v32  ;;  %v550_v55 = vld [vmem:[%s1171_s3 + $0x68] sm:$0xff]  ;;  %v549_v56 = vld [vmem:[%s1171_s3 + $0x60] sm:$0xff]  ;;  %v857_v57 = vld [vmem:[%s1171_s3 + $0x9a] ss:$0 sm:$0xff] }
  0x30   : > { %785 = vmatpush.msk.msrb.mxu0 %vm300_vm0, %v403_v18  ;;  %795 = vmatpush.msk.msrb.mxu2 %vm300_vm0, %v512_v41  ;;  %v613_v0 = vld [vmem:[%s1171_s3 + $0x80] sm:$0x1]  ;;  %v612_v1 = vld [vmem:[%s1171_s3 + $0x78] sm:$0xff]  ;;  %v644_v10 = vld [vmem:[%s1171_s3 + $0x90] sm:$0x1] }
  0x31   : > { %469 = vmatpush.msrb.mxu1 %v440_v33  ;;  %v858_v3 = vld [vmem:[%s1171_s3 + $0x9d] ss:$0 sm:$0xff]  ;;  %v588_v9 = vld [vmem:[%s250_s14] sm:$0xf] }
  0x32   : > { %430 = vmatpush.msrb.mxu0 %v402_v28  ;;  %539 = vmatpush.msrb.mxu2 %v511_v51 }
  0x34   : > { %798 = vmatpush.msk.msra.mxu0 %vm341_vm3, %v551_v54 }
  0x36   : > { %577 = vmatpush.msra.mxu0 %v550_v55 }
  0x37   : > { %774 = vmatmul.msk.f32.gmra.mxu0 %vm259_vm1, %v258_v4 }
  0x38   : > { %578 = vmatpush.msra.mxu0 %v549_v56 }
  0xac   : > { %v283_v6 = vpop.f32.mrf.mxu0 }
  0xad   : > { %776 = vmatmul.msk.f32.vlgmr.msra.gmra.mxu1 %vm293_vm2, %v283_v6 }
  0xb4   : > { %v286_v7 = vpop.f32.mrf.mxu0 }
  0xb5   : > { %777 = vmatmul.msk.f32.gmra.mxu1 %vm293_vm2, %v286_v7 }
 0x12a   : > { %v321_v12 = vpop.f32.mrf.mxu1 }
 0x12b   : > { %v322_v13 = vadd.f32 %v853_v11, %v321_v12 }
 0x12d   : > { %v327_v14 = vmax.f32 %v322_v13, 0.0  ;;  %v859_v13 = vld [vmem:[%s1171_s3 + $0x9e] ss:$0 sm:$0xff] }
 0x12f   : > { %779 = vmatmul.msk.f32.vlgmr.msra.gmra.mxu2 %vm334_vm4, %v327_v14 }
 0x130   : > { %804 = vmatpush.msk.msra.mxu2 %vm300_vm0, %v644_v10 }
 0x132   : > { %v324_v15 = vpop.f32.mrf.mxu1 }
 0x133   : > { %v325_v16 = vadd.f32 %v853_v11, %v324_v15  ;;  %v643_v11 = vld [vmem:[%s1171_s3 + $0x88] sm:$0xff] }
 0x134   : > { %668 = vmatpush.msra.mxu2 %v643_v11 }
 0x135   : > { %v328_v17 = vmax.f32 %v325_v16, 0.0 }
 0x137   : > { %780 = vmatmul.msk.f32.gmra.mxu2 %vm334_vm4, %v328_v17  ;;  %v860_v17 = vld [vmem:[%s1171_s3 + $0x9f] ss:$0 sm:$0xff] }
 0x1b2   : > { %v362_v19 = vpop.f32.mrf.mxu2 }
 0x1b3   : > { %v363_v22 = vadd.f32 %v854_v20, %v362_v19 }
 0x1b5   : > { %v368_v25 = vmax.f32 %v363_v22, 0.0 }
 0x1ba   : > { %v365_v21 = vpop.f32.mrf.mxu2 }
 0x1bb   : > { %v366_v23 = vadd.f32 %v854_v20, %v365_v21 }
 0x1bd   : > { %v369_v24 = vmax.f32 %v366_v23, 0.0 }
 0x1bf   : > { %393 = vmatpush.msra.mxu3 %v369_v24 }
 0x1c1   : > { %394 = vmatpush.msra.mxu3 %v368_v25 }
 0x1c2   : > { %783 = vmatmul.msk.f32.vlgmr.msra.gmra.mxu3 %vm259_vm1, %v781_v26 }
 0x1ca   : > { %784 = vmatmul.msk.f32.gmra.mxu3 %vm259_vm1, %v782_v27 }
 0x245   : > { %v396_v29 = vpop.f32.mrf.mxu3 }
 0x246   : > { %786 = vmatmul.msk.f32.vlgmr.msrb.gmra.mxu0 %vm293_vm2, %v396_v29 }
 0x24d   : > { %v399_v30 = vpop.f32.mrf.mxu3 }
 0x24e   : > { %787 = vmatmul.msk.f32.gmra.mxu0 %vm293_vm2, %v399_v30 }
 0x2c3   : > { %v432_v35 = vpop.f32.mrf.mxu0 }
 0x2c4   : > { %v433_v36 = vadd.f32 %v855_v34, %v432_v35 }
 0x2c6   : > { %v438_v37 = vmax.f32 %v433_v36, 0.0 }
 0x2c8   : > { %789 = vmatmul.msk.f32.vlgmr.msrb.gmra.mxu1 %vm334_vm4, %v438_v37 }
 0x2cb   : > { %v435_v38 = vpop.f32.mrf.mxu0 }
 0x2cc   : > { %v436_v39 = vadd.f32 %v855_v34, %v435_v38 }
 0x2ce   : > { %v439_v40 = vmax.f32 %v436_v39, 0.0 }
 0x2d0   : > { %790 = vmatmul.msk.f32.gmra.mxu1 %vm334_vm4, %v439_v40 }
 0x345   : > { %v471_v42 = vpop.f32.mrf.mxu1 }
 0x346   : > { %v472_v45 = vadd.f32 %v856_v43, %v471_v42 }
 0x348   : > { %v477_v48 = vmax.f32 %v472_v45, 0.0 }
 0x34d   : > { %v474_v44 = vpop.f32.mrf.mxu1 }
 0x34e   : > { %v475_v46 = vadd.f32 %v856_v43, %v474_v44 }
 0x350   : > { %v478_v47 = vmax.f32 %v475_v46, 0.0 }
 0x352   : > { %502 = vmatpush.msrb.mxu3 %v478_v47 }
 0x354   : > { %503 = vmatpush.msrb.mxu3 %v477_v48 }
 0x355   : > { %793 = vmatmul.msk.f32.vlgmr.msrb.gmra.mxu3 %vm259_vm1, %v791_v49 }
 0x356   : > { %802 = vmatpush.msk.msra.mxu3 %vm300_vm0, %v613_v0 }
 0x358   : > { %637 = vmatpush.msra.mxu3 %v612_v1 }
 0x35d   : > { %794 = vmatmul.msk.f32.gmra.mxu3 %vm259_vm1, %v792_v50 }
 0x3d8   : > { %v505_v52 = vpop.f32.mrf.mxu3 }
 0x3d9   : > { %796 = vmatmul.msk.f32.vlgmr.msrb.gmra.mxu2 %vm293_vm2, %v505_v52 }
 0x3e0   : > { %v508_v53 = vpop.f32.mrf.mxu3 }
 0x3e1   : > { %797 = vmatmul.msk.f32.gmra.mxu2 %vm293_vm2, %v508_v53 }
 0x45c   : > { %v541_v58 = vpop.f32.mrf.mxu2 }
 0x45d   : > { %v542_v59 = vadd.f32 %v857_v57, %v541_v58 }
 0x45f   : > { %v547_v60 = vmax.f32 %v542_v59, 0.0 }
 0x461   : > { %799 = vmatmul.msk.f32.vlgmr.msra.gmra.mxu0 %vm334_vm4, %v547_v60 }
 0x464   : > { %v544_v61 = vpop.f32.mrf.mxu2 }
 0x465   : > { %v545_v62 = vadd.f32 %v857_v57, %v544_v61 }
 0x467   : > { %v548_v63 = vmax.f32 %v545_v62, 0.0 }
 0x469   : > { %800 = vmatmul.msk.f32.gmra.mxu0 %vm334_vm4, %v548_v63 }
 0x4de   : > { %v580_v2 = vpop.f32.mrf.mxu0 }
 0x4df   : > { %v581_v5 = vadd.f32 %v858_v3, %v580_v2 }
 0x4e1   : > { %v586_v8 = vmax.f32 %v581_v5, 0.0 }
 0x4e6   : > { %v583_v4 = vpop.f32.mrf.mxu0 }
 0x4e7   : > { %v584_v6 = vadd.f32 %v858_v3, %v583_v4 }
 0x4e9   : > { %v587_v7 = vmax.f32 %v584_v6, 0.0 }
 0x4eb   : > { %606 = vmatpush.msra.mxu1 %v587_v7 }
 0x4ed   : > { %607 = vmatpush.msra.mxu1 %v586_v8 }
 0x4ee   : > { %801 = vmatmul.msk.f32.vlgmr.msra.gmra.mxu1 %vm259_vm1, %v588_v9 }
 0x56b   : > { %v609_v12 = vpop.f32.mrf.mxu1 }
 0x56c   : > { %803 = vmatmul.msk.f32.vlgmr.msra.gmra.mxu3 %vm293_vm2, %v609_v12 }
 0x5ef   : > { %v639_v14 = vpop.f32.mrf.mxu3 }
 0x5f0   : > { %v640_v15 = vadd.f32 %v859_v13, %v639_v14 }
 0x5f2   : > { %v642_v16 = vmax.f32 %v640_v15, 0.0 }
 0x5f4   : > { %805 = vmatmul.msk.f32.vlgmr.msra.gmra.mxu2 %vm293_vm2, %v642_v16 }
 0x677   : > { %v670_v18 = vpop.f32.mrf.mxu2 }
 0x678   : > { %v671_v19 = vadd.f32 %v860_v17, %v670_v18 }
 0x67a   : > { %674 = vst.msk [vmem:[%s254_s28] sm:$0xf] %vm673_vm5, %v671_v19 }
 0x67b PF: > { %p14_p7 = scmp.ge.s32.totalorder %s976_s20, 10   ;;  %s1175_s15 = smov %s917_s16 }
 0x67c   : > { %s1176_s16 = smov %s921_s17  ;;  %s1177_s17 = smov %s986_s23 }
 0x67d   : > { %s1178_s18 = smov %s976_s20  ;;  %16 = sbr.rel (!%p14_p7) target bundleno = 3 (0x3), region = 84 }
 0x682   :  { %694 = vsyncpa [#allocation3], 1 }
 0x683   :  { %696 = vsyncpa [#allocation3 + $0x1], 1 }

</bundles_post_ra>
